<compile_context>
chip_gen: v7x
topology: tpu7x:2x2x1
jax: 0.10.0
libtpu: 0.0.40
codegen_flags: <defaults>
</compile_context>

<pallas_src>
import jax
import jax.numpy as jnp
from jax.experimental import pallas as pl
from jax.experimental.pallas import tpu as pltpu


def _loss_kernel(x_ref, t_ref, acc_ref):
    """Per-tile body.  acc_ref is the resident (1, 8, 8, 128) per-chunk accumulator."""
    i = pl.program_id(1)

    @pl.when(i == 0)
    def _init():
        acc_ref[...] = jnp.zeros_like(acc_ref)

    x = x_ref[...].astype(jnp.float32)   # logits (padding = 0.0)
    t = t_ref[...].astype(jnp.float32)   # targets (padding sentinel 0.5 is inert)

    # BCE straight from logits == BCELoss(sigmoid(x), t) incl. its -100 log clamp:
    #   -log(sigmoid(x))     = softplus(-x)  -> clamped at +100
    #   -log(1 - sigmoid(x)) = softplus(x)   -> clamped at +100
    sp_pos = jnp.maximum(x, 0.0) + jnp.log1p(jnp.exp(-jnp.abs(x)))   # softplus(x)
    nlog_p = jnp.minimum(sp_pos - x, 100.0)        # -log(p),   clamped
    nlog_1mp = jnp.minimum(sp_pos, 100.0)          # -log(1-p), clamped
    bce = nlog_1mp + t * (nlog_p - nlog_1mp)       # t*(-log p) + (1-t)*(-log(1-p))

    one = jnp.float32(1.0)
    zero = jnp.float32(0.0)
    pred_pos = x > 0.0                             # == (sigmoid(x) > 0.5)
    pos_f = jnp.where(t > 0.5, one, zero)
    neg_f = jnp.where(t < 0.5, one, zero)
    one_f = jnp.where(t == 1.0, one, zero)
    zero_f = jnp.where(t == 0.0, one, zero)

    parts = (
        bce * pos_f,                        # 0: sum of BCE over positives
        bce * neg_f,                        # 1: sum of BCE over negatives
        pos_f,                              # 2: positive count (t > 0.5)
        neg_f,                              # 3: negative count (t < 0.5)
        one_f,                              # 4: pos_true   (t == 1)
        zero_f,                             # 5: neg_true   (t == 0)
        jnp.where(pred_pos, one_f, zero),   # 6: pos_correct
        jnp.where(pred_pos, zero, zero_f),  # 7: neg_correct
    )
    for q, v in enumerate(parts):
        # (tile_rows, 128) -> (8, 128) partial sums: pure vreg-wise VPU adds, no XLU.
        acc_ref[0, q, :, :] += jnp.sum(v.reshape(-1, 8, 128), axis=0)


def loss_forward(predictions, targets, enable_mining=False):
    """Pallas equivalent of Loss(enable_mining=False).forward(predictions, targets)."""
    assert not enable_mining, "mining path not supported (dynamic-size topk)"
    LANE, SUB = 128, 8
    x = predictions.reshape(-1)
    t = targets.reshape(-1)
    if not jnp.issubdtype(t.dtype, jnp.floating):
        t = t.astype(jnp.float32)          # so the 0.5 sentinel pad is representable
    n = x.shape[0]

    # Tile geometry: up to (2048, 128) f32 (1 MiB) per input block, grid exactly covers
    # the padded flat length so no block over-runs and no in-kernel masking is needed.
    rows_needed = -(-n // LANE)
    rows_needed = -(-rows_needed // SUB) * SUB          # multiple of 8
    tile_rows = min(2048, rows_needed)
    tile_elems = tile_rows * LANE
    num_tiles = -(-n // tile_elems)
    padded = num_tiles * tile_elems
    if padded != n:
        # Inert padding: t = 0.5 falls in no group / no counter; x = 0 keeps bce finite.
        x = jnp.pad(x, (0, padded - n))
        t = jnp.pad(t, (0, padded - n), constant_values=0.5)
    rows = padded // LANE
    x = x.reshape(rows, LANE)
    t = t.reshape(rows, LANE)

    num_chunks = 2 if (num_tiles >= 2 and num_tiles % 2 == 0) else 1  # v7x: 1 per TC
    tpc = num_tiles // num_chunks

    data_map = lambda c, i: (c * tpc + i, 0)

    partials = pl.pallas_call(
        _loss_kernel,
        out_shape=jax.ShapeDtypeStruct((num_chunks, 8, 8, 128), jnp.float32),
        grid=(num_chunks, tpc),
        in_specs=[pl.BlockSpec((tile_rows, LANE), data_map),
                  pl.BlockSpec((tile_rows, LANE), data_map)],
        out_specs=pl.BlockSpec((1, 8, 8, 128), lambda c, i: (c, 0, 0, 0)),
        compiler_params=pltpu.CompilerParams(
            dimension_semantics=("parallel", "arbitrary"),
            vmem_limit_bytes=32 * 1024 * 1024),
    )(x, t)

    # Tiny final cross-lane / cross-chunk reduce + loss math in plain JAX.
    s = jnp.sum(partials, axis=(0, 2, 3))       # (8,)
    pos_sum, neg_sum, pos_cnt, neg_cnt = s[0], s[1], s[2], s[3]
    pos_true, neg_true, pos_corr, neg_corr = s[4], s[5], s[6], s[7]

    pos_loss = jnp.where(pos_cnt > 0.0,
                         0.5 * pos_sum / jnp.maximum(pos_cnt, 1.0), 0.0)
    neg_loss = jnp.where(neg_cnt > 0.0,
                         0.5 * neg_sum / jnp.maximum(neg_cnt, 1.0), 0.0)
    total_loss = pos_loss + neg_loss
    return [total_loss,
            pos_corr.astype(jnp.int32), pos_true.astype(jnp.int32),
            neg_corr.astype(jnp.int32), neg_true.astype(jnp.int32)]


def _reference(predictions, targets):
    """Pure-JAX reference mirroring the PyTorch forward (enable_mining=False)."""
    p = jax.nn.sigmoid(predictions.reshape(-1).astype(jnp.float32))
    t = targets.reshape(-1).astype(jnp.float32)
    bce = -(t * jnp.maximum(jnp.log(p), -100.0)
            + (1.0 - t) * jnp.maximum(jnp.log(1.0 - p), -100.0))
    pos_m = (t > 0.5).astype(jnp.float32)
    neg_m = (t < 0.5).astype(jnp.float32)
    pos_loss = jnp.where(pos_m.sum() > 0,
                         0.5 * (bce * pos_m).sum() / jnp.maximum(pos_m.sum(), 1.0), 0.0)
    neg_loss = jnp.where(neg_m.sum() > 0,
                         0.5 * (bce * neg_m).sum() / jnp.maximum(neg_m.sum(), 1.0), 0.0)
    pred_b = p > 0.5
    pos_true = (t == 1.0).sum()
    neg_true = (t == 0.0).sum()
    pos_correct = (pred_b & (t == 1.0)).sum()
    neg_correct = ((~pred_b) & (t == 0.0)).sum()
    return [pos_loss + neg_loss, pos_correct, pos_true, neg_correct, neg_true]


if __name__ == "__main__":
    key = jax.random.PRNGKey(0)
    k1, k2, k3, k4 = jax.random.split(key, 4)

    # Segmentation-style score map (NCHW), evenly tiled case.
    pred1 = jax.random.normal(k1, (2, 4, 16, 16), dtype=jnp.float32)
    tgt1 = jax.random.bernoulli(k2, 0.3, (2, 4, 16, 16)).astype(jnp.float32)
    # Ragged case exercising the inert-sentinel padding path.
    pred2 = jax.random.normal(k3, (1, 3, 7, 11), dtype=jnp.float32)
    tgt2 = jax.random.bernoulli(k4, 0.5, (1, 3, 7, 11)).astype(jnp.float32)

    for pred, tgt in ((pred1, tgt1), (pred2, tgt2)):
        out = loss_forward(pred, tgt)
        out = [jax.block_until_ready(o) for o in out]
        ref = _reference(pred, tgt)
        assert abs(float(out[0]) - float(ref[0])) < 1e-4, (out[0], ref[0])
        for i in range(1, 5):
            assert int(out[i]) == int(ref[i]), (i, out[i], ref[i])

    print("KERNEL_OK")
</pallas_src>

<mosaic_0001>
module attributes {stable_mosaic.version = 11 : i64} {
  func.func @_loss_kernel(%arg0: i32, %arg1: i32, %arg2: memref<16x128xf32, #tpu.memory_space<vmem>>, %arg3: memref<16x128xf32, #tpu.memory_space<vmem>>, %arg4: memref<1x8x8x128xf32, #tpu.memory_space<vmem>>) attributes {dimension_semantics = [#tpu.dimension_semantics<parallel>, #tpu.dimension_semantics<arbitrary>], iteration_bounds = array<i64: 1, 1>, scalar_prefetch = 0 : i64, scratch_operands = 0 : i64, tpu.core_type = #tpu.core_type<tc>, window_params = [{transform_indices = @transform_0, window_bounds = array<i64: 16, 128>}, {transform_indices = @transform_1, window_bounds = array<i64: 16, 128>}, {transform_indices = @transform_2, window_bounds = array<i64: 1, 8, 8, 128>}]} {
    %c0_i32 = arith.constant 0 : i32
    %0 = arith.cmpi eq, %arg1, %c0_i32 : i32
    %1 = arith.extui %0 : i1 to i32
    %c0_i32_0 = arith.constant 0 : i32
    %2 = arith.cmpi ne, %1, %c0_i32_0 : i32
    scf.if %2 {
      %cst_87 = arith.constant 0.000000e+00 : f32
      %113 = vector.broadcast %cst_87 : f32 to vector<1x8x8x128xf32>
      %c0_88 = arith.constant 0 : index
      %c0_89 = arith.constant 0 : index
      %c0_90 = arith.constant 0 : index
      %c0_91 = arith.constant 0 : index
      %114 = vector.load %arg4[%c0_88, %c0_89, %c0_90, %c0_91] : memref<1x8x8x128xf32, #tpu.memory_space<vmem>>, vector<1x8x8x128xf32>
      tpu.vector_store %arg4[%c0_88, %c0_89, %c0_90, %c0_91], %113 {strides = array<i32>} : memref<1x8x8x128xf32, #tpu.memory_space<vmem>>, vector<1x8x8x128xf32>,
    } else {
    }
    %c0 = arith.constant 0 : index
    %c0_1 = arith.constant 0 : index
    %3 = vector.load %arg2[%c0, %c0_1] : memref<16x128xf32, #tpu.memory_space<vmem>>, vector<16x128xf32>
    %c0_2 = arith.constant 0 : index
    %c0_3 = arith.constant 0 : index
    %4 = vector.load %arg3[%c0_2, %c0_3] : memref<16x128xf32, #tpu.memory_space<vmem>>, vector<16x128xf32>
    %cst = arith.constant 0.000000e+00 : f32
    %5 = vector.broadcast %cst : f32 to vector<16x128xf32>
    %6 = arith.maximumf %3, %5 : vector<16x128xf32>
    %7 = math.absf %3 : vector<16x128xf32>
    %cst_4 = arith.constant 0.000000e+00 : f32
    %8 = vector.broadcast %cst_4 : f32 to vector<16x128xf32>
    %9 = arith.subf %8, %7 : vector<16x128xf32>
    %10 = math.exp %9 : vector<16x128xf32>
    %11 = math.log1p %10 : vector<16x128xf32>
    %12 = arith.addf %6, %11 : vector<16x128xf32>
    %13 = arith.subf %12, %3 : vector<16x128xf32>
    %cst_5 = arith.constant 1.000000e+02 : f32
    %14 = vector.broadcast %cst_5 : f32 to vector<16x128xf32>
    %15 = arith.minimumf %13, %14 : vector<16x128xf32>
    %cst_6 = arith.constant 1.000000e+02 : f32
    %16 = vector.broadcast %cst_6 : f32 to vector<16x128xf32>
    %17 = arith.minimumf %12, %16 : vector<16x128xf32>
    %18 = arith.subf %15, %17 : vector<16x128xf32>
    %19 = arith.mulf %4, %18 : vector<16x128xf32>
    %20 = arith.addf %17, %19 : vector<16x128xf32>
    %cst_7 = arith.constant 0.000000e+00 : f32
    %21 = vector.broadcast %cst_7 : f32 to vector<16x128xf32>
    %22 = arith.cmpf ogt, %3, %21 : vector<16x128xf32>
    %cst_8 = arith.constant 5.000000e-01 : f32
    %23 = vector.broadcast %cst_8 : f32 to vector<16x128xf32>
    %24 = arith.cmpf ogt, %4, %23 : vector<16x128xf32>
    %cst_9 = arith.constant 1.000000e+00 : f32
    %cst_10 = arith.constant 0.000000e+00 : f32
    %25 = vector.broadcast %cst_9 : f32 to vector<16x128xf32>
    %26 = vector.broadcast %cst_10 : f32 to vector<16x128xf32>
    %27 = arith.select %24, %25, %26 : vector<16x128xi1>, vector<16x128xf32>
    %cst_11 = arith.constant 5.000000e-01 : f32
    %28 = vector.broadcast %cst_11 : f32 to vector<16x128xf32>
    %29 = arith.cmpf olt, %4, %28 : vector<16x128xf32>
    %cst_12 = arith.constant 1.000000e+00 : f32
    %cst_13 = arith.constant 0.000000e+00 : f32
    %30 = vector.broadcast %cst_12 : f32 to vector<16x128xf32>
    %31 = vector.broadcast %cst_13 : f32 to vector<16x128xf32>
    %32 = arith.select %29, %30, %31 : vector<16x128xi1>, vector<16x128xf32>
    %cst_14 = arith.constant 1.000000e+00 : f32
    %33 = vector.broadcast %cst_14 : f32 to vector<16x128xf32>
    %34 = arith.cmpf oeq, %4, %33 : vector<16x128xf32>
    %cst_15 = arith.constant 1.000000e+00 : f32
    %cst_16 = arith.constant 0.000000e+00 : f32
    %35 = vector.broadcast %cst_15 : f32 to vector<16x128xf32>
    %36 = vector.broadcast %cst_16 : f32 to vector<16x128xf32>
    %37 = arith.select %34, %35, %36 : vector<16x128xi1>, vector<16x128xf32>
    %cst_17 = arith.constant 0.000000e+00 : f32
    %38 = vector.broadcast %cst_17 : f32 to vector<16x128xf32>
    %39 = arith.cmpf oeq, %4, %38 : vector<16x128xf32>
    %cst_18 = arith.constant 1.000000e+00 : f32
    %cst_19 = arith.constant 0.000000e+00 : f32
    %40 = vector.broadcast %cst_18 : f32 to vector<16x128xf32>
    %41 = vector.broadcast %cst_19 : f32 to vector<16x128xf32>
    %42 = arith.select %39, %40, %41 : vector<16x128xi1>, vector<16x128xf32>
    %43 = arith.mulf %20, %27 : vector<16x128xf32>
    %44 = arith.mulf %20, %32 : vector<16x128xf32>
    %cst_20 = arith.constant 0.000000e+00 : f32
    %45 = vector.broadcast %cst_20 : f32 to vector<16x128xf32>
    %46 = arith.select %22, %37, %45 : vector<16x128xi1>, vector<16x128xf32>
    %cst_21 = arith.constant 0.000000e+00 : f32
    %47 = vector.broadcast %cst_21 : f32 to vector<16x128xf32>
    %48 = arith.select %22, %47, %42 : vector<16x128xi1>, vector<16x128xf32>
    %c0_22 = arith.constant 0 : index
    %c0_23 = arith.constant 0 : index
    %c0_24 = arith.constant 0 : index
    %c0_25 = arith.constant 0 : index
    %49 = vector.load %arg4[%c0_22, %c0_23, %c0_24, %c0_25] : memref<1x8x8x128xf32, #tpu.memory_space<vmem>>, vector<1x1x8x128xf32>
    %50 = vector.shape_cast %49 : vector<1x1x8x128xf32> to vector<8x128xf32>
    %51 = vector.shape_cast %43 : vector<16x128xf32> to vector<2x8x128xf32>
    %cst_26 = arith.constant dense<0.000000e+00> : vector<8x128xf32>
    %52 = vector.multi_reduction <add>, %51, %cst_26 [0] : vector<2x8x128xf32> to vector<8x128xf32>
    %53 = arith.addf %50, %52 : vector<8x128xf32>
    %c0_27 = arith.constant 0 : index
    %c0_28 = arith.constant 0 : index
    %c0_29 = arith.constant 0 : index
    %c0_30 = arith.constant 0 : index
    %54 = vector.load %arg4[%c0_27, %c0_28, %c0_29, %c0_30] : memref<1x8x8x128xf32, #tpu.memory_space<vmem>>, vector<1x1x8x128xf32>
    %55 = vector.shape_cast %54 : vector<1x1x8x128xf32> to vector<8x128xf32>
    %56 = vector.shape_cast %53 : vector<8x128xf32> to vector<1x1x8x128xf32>
    tpu.vector_store %arg4[%c0_27, %c0_28, %c0_29, %c0_30], %56 {strides = array<i32>} : memref<1x8x8x128xf32, #tpu.memory_space<vmem>>, vector<1x1x8x128xf32>,
    %c0_31 = arith.constant 0 : index
    %c1 = arith.constant 1 : index
    %c0_32 = arith.constant 0 : index
    %c0_33 = arith.constant 0 : index
    %57 = vector.load %arg4[%c0_31, %c1, %c0_32, %c0_33] : memref<1x8x8x128xf32, #tpu.memory_space<vmem>>, vector<1x1x8x128xf32>
    %58 = vector.shape_cast %57 : vector<1x1x8x128xf32> to vector<8x128xf32>
    %59 = vector.shape_cast %44 : vector<16x128xf32> to vector<2x8x128xf32>
    %cst_34 = arith.constant dense<0.000000e+00> : vector<8x128xf32>
    %60 = vector.multi_reduction <add>, %59, %cst_34 [0] : vector<2x8x128xf32> to vector<8x128xf32>
    %61 = arith.addf %58, %60 : vector<8x128xf32>
    %c0_35 = arith.constant 0 : index
    %c1_36 = arith.constant 1 : index
    %c0_37 = arith.constant 0 : index
    %c0_38 = arith.constant 0 : index
    %62 = vector.load %arg4[%c0_35, %c1_36, %c0_37, %c0_38] : memref<1x8x8x128xf32, #tpu.memory_space<vmem>>, vector<1x1x8x128xf32>
    %63 = vector.shape_cast %62 : vector<1x1x8x128xf32> to vector<8x128xf32>
    %64 = vector.shape_cast %61 : vector<8x128xf32> to vector<1x1x8x128xf32>
    tpu.vector_store %arg4[%c0_35, %c1_36, %c0_37, %c0_38], %64 {strides = array<i32>} : memref<1x8x8x128xf32, #tpu.memory_space<vmem>>, vector<1x1x8x128xf32>,
    %c0_39 = arith.constant 0 : index
    %c2 = arith.constant 2 : index
    %c0_40 = arith.constant 0 : index
    %c0_41 = arith.constant 0 : index
    %65 = vector.load %arg4[%c0_39, %c2, %c0_40, %c0_41] : memref<1x8x8x128xf32, #tpu.memory_space<vmem>>, vector<1x1x8x128xf32>
    %66 = vector.shape_cast %65 : vector<1x1x8x128xf32> to vector<8x128xf32>
    %67 = vector.shape_cast %27 : vector<16x128xf32> to vector<2x8x128xf32>
    %cst_42 = arith.constant dense<0.000000e+00> : vector<8x128xf32>
    %68 = vector.multi_reduction <add>, %67, %cst_42 [0] : vector<2x8x128xf32> to vector<8x128xf32>
    %69 = arith.addf %66, %68 : vector<8x128xf32>
    %c0_43 = arith.constant 0 : index
    %c2_44 = arith.constant 2 : index
    %c0_45 = arith.constant 0 : index
    %c0_46 = arith.constant 0 : index
    %70 = vector.load %arg4[%c0_43, %c2_44, %c0_45, %c0_46] : memref<1x8x8x128xf32, #tpu.memory_space<vmem>>, vector<1x1x8x128xf32>
    %71 = vector.shape_cast %70 : vector<1x1x8x128xf32> to vector<8x128xf32>
    %72 = vector.shape_cast %69 : vector<8x128xf32> to vector<1x1x8x128xf32>
    tpu.vector_store %arg4[%c0_43, %c2_44, %c0_45, %c0_46], %72 {strides = array<i32>} : memref<1x8x8x128xf32, #tpu.memory_space<vmem>>, vector<1x1x8x128xf32>,
    %c0_47 = arith.constant 0 : index
    %c3 = arith.constant 3 : index
    %c0_48 = arith.constant 0 : index
    %c0_49 = arith.constant 0 : index
    %73 = vector.load %arg4[%c0_47, %c3, %c0_48, %c0_49] : memref<1x8x8x128xf32, #tpu.memory_space<vmem>>, vector<1x1x8x128xf32>
    %74 = vector.shape_cast %73 : vector<1x1x8x128xf32> to vector<8x128xf32>
    %75 = vector.shape_cast %32 : vector<16x128xf32> to vector<2x8x128xf32>
    %cst_50 = arith.constant dense<0.000000e+00> : vector<8x128xf32>
    %76 = vector.multi_reduction <add>, %75, %cst_50 [0] : vector<2x8x128xf32> to vector<8x128xf32>
    %77 = arith.addf %74, %76 : vector<8x128xf32>
    %c0_51 = arith.constant 0 : index
    %c3_52 = arith.constant 3 : index
    %c0_53 = arith.constant 0 : index
    %c0_54 = arith.constant 0 : index
    %78 = vector.load %arg4[%c0_51, %c3_52, %c0_53, %c0_54] : memref<1x8x8x128xf32, #tpu.memory_space<vmem>>, vector<1x1x8x128xf32>
    %79 = vector.shape_cast %78 : vector<1x1x8x128xf32> to vector<8x128xf32>
    %80 = vector.shape_cast %77 : vector<8x128xf32> to vector<1x1x8x128xf32>
    tpu.vector_store %arg4[%c0_51, %c3_52, %c0_53, %c0_54], %80 {strides = array<i32>} : memref<1x8x8x128xf32, #tpu.memory_space<vmem>>, vector<1x1x8x128xf32>,
    %c0_55 = arith.constant 0 : index
    %c4 = arith.constant 4 : index
    %c0_56 = arith.constant 0 : index
    %c0_57 = arith.constant 0 : index
    %81 = vector.load %arg4[%c0_55, %c4, %c0_56, %c0_57] : memref<1x8x8x128xf32, #tpu.memory_space<vmem>>, vector<1x1x8x128xf32>
    %82 = vector.shape_cast %81 : vector<1x1x8x128xf32> to vector<8x128xf32>
    %83 = vector.shape_cast %37 : vector<16x128xf32> to vector<2x8x128xf32>
    %cst_58 = arith.constant dense<0.000000e+00> : vector<8x128xf32>
    %84 = vector.multi_reduction <add>, %83, %cst_58 [0] : vector<2x8x128xf32> to vector<8x128xf32>
    %85 = arith.addf %82, %84 : vector<8x128xf32>
    %c0_59 = arith.constant 0 : index
    %c4_60 = arith.constant 4 : index
    %c0_61 = arith.constant 0 : index
    %c0_62 = arith.constant 0 : index
    %86 = vector.load %arg4[%c0_59, %c4_60, %c0_61, %c0_62] : memref<1x8x8x128xf32, #tpu.memory_space<vmem>>, vector<1x1x8x128xf32>
    %87 = vector.shape_cast %86 : vector<1x1x8x128xf32> to vector<8x128xf32>
    %88 = vector.shape_cast %85 : vector<8x128xf32> to vector<1x1x8x128xf32>
    tpu.vector_store %arg4[%c0_59, %c4_60, %c0_61, %c0_62], %88 {strides = array<i32>} : memref<1x8x8x128xf32, #tpu.memory_space<vmem>>, vector<1x1x8x128xf32>,
    %c0_63 = arith.constant 0 : index
    %c5 = arith.constant 5 : index
    %c0_64 = arith.constant 0 : index
    %c0_65 = arith.constant 0 : index
    %89 = vector.load %arg4[%c0_63, %c5, %c0_64, %c0_65] : memref<1x8x8x128xf32, #tpu.memory_space<vmem>>, vector<1x1x8x128xf32>
    %90 = vector.shape_cast %89 : vector<1x1x8x128xf32> to vector<8x128xf32>
    %91 = vector.shape_cast %42 : vector<16x128xf32> to vector<2x8x128xf32>
    %cst_66 = arith.constant dense<0.000000e+00> : vector<8x128xf32>
    %92 = vector.multi_reduction <add>, %91, %cst_66 [0] : vector<2x8x128xf32> to vector<8x128xf32>
    %93 = arith.addf %90, %92 : vector<8x128xf32>
    %c0_67 = arith.constant 0 : index
    %c5_68 = arith.constant 5 : index
    %c0_69 = arith.constant 0 : index
    %c0_70 = arith.constant 0 : index
    %94 = vector.load %arg4[%c0_67, %c5_68, %c0_69, %c0_70] : memref<1x8x8x128xf32, #tpu.memory_space<vmem>>, vector<1x1x8x128xf32>
    %95 = vector.shape_cast %94 : vector<1x1x8x128xf32> to vector<8x128xf32>
    %96 = vector.shape_cast %93 : vector<8x128xf32> to vector<1x1x8x128xf32>
    tpu.vector_store %arg4[%c0_67, %c5_68, %c0_69, %c0_70], %96 {strides = array<i32>} : memref<1x8x8x128xf32, #tpu.memory_space<vmem>>, vector<1x1x8x128xf32>,
    %c0_71 = arith.constant 0 : index
    %c6 = arith.constant 6 : index
    %c0_72 = arith.constant 0 : index
    %c0_73 = arith.constant 0 : index
    %97 = vector.load %arg4[%c0_71, %c6, %c0_72, %c0_73] : memref<1x8x8x128xf32, #tpu.memory_space<vmem>>, vector<1x1x8x128xf32>
    %98 = vector.shape_cast %97 : vector<1x1x8x128xf32> to vector<8x128xf32>
    %99 = vector.shape_cast %46 : vector<16x128xf32> to vector<2x8x128xf32>
    %cst_74 = arith.constant dense<0.000000e+00> : vector<8x128xf32>
    %100 = vector.multi_reduction <add>, %99, %cst_74 [0] : vector<2x8x128xf32> to vector<8x128xf32>
    %101 = arith.addf %98, %100 : vector<8x128xf32>
    %c0_75 = arith.constant 0 : index
    %c6_76 = arith.constant 6 : index
    %c0_77 = arith.constant 0 : index
    %c0_78 = arith.constant 0 : index
    %102 = vector.load %arg4[%c0_75, %c6_76, %c0_77, %c0_78] : memref<1x8x8x128xf32, #tpu.memory_space<vmem>>, vector<1x1x8x128xf32>
    %103 = vector.shape_cast %102 : vector<1x1x8x128xf32> to vector<8x128xf32>
    %104 = vector.shape_cast %101 : vector<8x128xf32> to vector<1x1x8x128xf32>
    tpu.vector_store %arg4[%c0_75, %c6_76, %c0_77, %c0_78], %104 {strides = array<i32>} : memref<1x8x8x128xf32, #tpu.memory_space<vmem>>, vector<1x1x8x128xf32>,
    %c0_79 = arith.constant 0 : index
    %c7 = arith.constant 7 : index
    %c0_80 = arith.constant 0 : index
    %c0_81 = arith.constant 0 : index
    %105 = vector.load %arg4[%c0_79, %c7, %c0_80, %c0_81] : memref<1x8x8x128xf32, #tpu.memory_space<vmem>>, vector<1x1x8x128xf32>
    %106 = vector.shape_cast %105 : vector<1x1x8x128xf32> to vector<8x128xf32>
    %107 = vector.shape_cast %48 : vector<16x128xf32> to vector<2x8x128xf32>
    %cst_82 = arith.constant dense<0.000000e+00> : vector<8x128xf32>
    %108 = vector.multi_reduction <add>, %107, %cst_82 [0] : vector<2x8x128xf32> to vector<8x128xf32>
    %109 = arith.addf %106, %108 : vector<8x128xf32>
    %c0_83 = arith.constant 0 : index
    %c7_84 = arith.constant 7 : index
    %c0_85 = arith.constant 0 : index
    %c0_86 = arith.constant 0 : index
    %110 = vector.load %arg4[%c0_83, %c7_84, %c0_85, %c0_86] : memref<1x8x8x128xf32, #tpu.memory_space<vmem>>, vector<1x1x8x128xf32>
    %111 = vector.shape_cast %110 : vector<1x1x8x128xf32> to vector<8x128xf32>
    %112 = vector.shape_cast %109 : vector<8x128xf32> to vector<1x1x8x128xf32>
    tpu.vector_store %arg4[%c0_83, %c7_84, %c0_85, %c0_86], %112 {strides = array<i32>} : memref<1x8x8x128xf32, #tpu.memory_space<vmem>>, vector<1x1x8x128xf32>,
    return
  }
  func.func @transform_0(%arg0: i32, %arg1: i32) -> (i32, i32) {
    %c1_i32 = arith.constant 1 : i32
    %0 = arith.muli %arg0, %c1_i32 : i32
    %1 = arith.addi %0, %arg1 : i32
    %c0_i32 = arith.constant 0 : i32
    %c0_i32_0 = arith.constant 0 : i32
    return %1, %c0_i32 : i32, i32
  }
  func.func @transform_1(%arg0: i32, %arg1: i32) -> (i32, i32) {
    %c1_i32 = arith.constant 1 : i32
    %0 = arith.muli %arg0, %c1_i32 : i32
    %1 = arith.addi %0, %arg1 : i32
    %c0_i32 = arith.constant 0 : i32
    %c0_i32_0 = arith.constant 0 : i32
    return %1, %c0_i32 : i32, i32
  }
  func.func @transform_2(%arg0: i32, %arg1: i32) -> (i32, i32, i32, i32) {
    %c0_i32 = arith.constant 0 : i32
    %c0_i32_0 = arith.constant 0 : i32
    %c0_i32_1 = arith.constant 0 : i32
    %c0_i32_2 = arith.constant 0 : i32
    return %arg0, %c0_i32, %c0_i32_0, %c0_i32_1 : i32, i32, i32, i32
  }
}

</mosaic_0001>

<bundles_post_ra>
// kernel: tpu_custom_call.1
= control target key start
LH: loop header
LB: loop body
LE: loop exit
PB: predicated region body
PF: predicated region fallthrough
CT: control target
= control target key end

     0   :  { %7 = vsyncpa [#allocation3], 0  ;;  %s387_s0 = inlined_call_operand.hbm [shape: f32[16,128], index: 0, kind: input, shape index: {}]   ;;  %s388_s1 = inlined_call_operand.hbm [shape: f32[16,128], index: 1, kind: input, shape index: {}]   ;;  %s389_s2 = inlined_call_operand.hbm [shape: f32[1,8,8,128], index: 2, kind: output, shape index: {}]  }
   0x1   :  { %8 = vsyncpa [#allocation6], 0 }
   0x2   :  { %9 = vsyncpa [#allocation4], 0  ;;  %s279_s9 = smov [#allocation2]   ;;  %s207_s13 = scalar_lea.hbm %s387_s0, 256 }
   0x3   :  { %s19_s10 = sshll.u32 %s279_s9, 4  ;;  %p208_p0 = scmp.ne.s32.totalorder %s387_s0, %s207_s13  ;;  %s20_s10 = int_to_ptr.vmem [resolvable:$true] %s19_s10 }
   0x4   :  { %p211_p1 = scmp.lt.u32.totalorder %s207_s13, %s387_s0 }
   0x6   :  { %p213_p2 = pnand %p211_p1, %p208_p0 }
   0x8   :  { %216 = shalt.err (!%p213_p2)
}
   0x9   :  { %s217_s18 = scalar_lea.vmem %s20_s10, 256  ;;  %p222_p4 = scmp.lt.s32.totalorder %s20_s10, %s20_s10 }
   0xa   :  { %p218_p3 = scmp.ne.s32.totalorder %s20_s10, %s217_s18  ;;  %p223_p5 = scmp.lt.s32.totalorder %s217_s18, %s217_s18 }
   0xc   :  { %p224_p6 = por %p223_p5, %p222_p4 }
   0xe   :  { %p225_p7 = pnand %p224_p6, %p218_p3 }
  0x10   :  { %228 = shalt.err (!%p225_p7)
}
  0x11   :  { %s280_s19 = smov 128   ;;  %s281_s20 = smov 8  }
  0x12   :  { %25 = dma.hbm_to_vmem [thread:$0]  %s387_s0, 256, %s20_s10, [#allocation3], %s280_s19, %s280_s19, %s281_s20  }
  0x13   :  { %s282_s23 = smov [#allocation5]   ;;  %s229_s27 = scalar_lea.hbm %s388_s1, 256 }
  0x14   :  { %s35_s24 = sshll.u32 %s282_s23, 4  ;;  %p230_p8 = scmp.ne.s32.totalorder %s388_s1, %s229_s27  ;;  %s36_s24 = int_to_ptr.vmem [resolvable:$true] %s35_s24 }
  0x15   :  { %p233_p9 = scmp.lt.u32.totalorder %s229_s27, %s388_s1 }
  0x17   :  { %p235_p10 = pnand %p233_p9, %p230_p8 }
  0x19   :  { %238 = shalt.err (!%p235_p10)
}
  0x1a   :  { %s239_s4 = scalar_lea.vmem %s36_s24, 256  ;;  %p244_p12 = scmp.lt.s32.totalorder %s36_s24, %s36_s24 }
  0x1b   :  { %p240_p11 = scmp.ne.s32.totalorder %s36_s24, %s239_s4  ;;  %p245_p13 = scmp.lt.s32.totalorder %s239_s4, %s239_s4 }
  0x1d   :  { %p246_p0 = por %p245_p13, %p244_p12 }
  0x1f   :  { %p247_p1 = pnand %p246_p0, %p240_p11 }
  0x21   :  { %250 = shalt.err (!%p247_p1)
}
  0x22   :  { %41 = dma.hbm_to_vmem [thread:$0]  %s388_s1, 256, %s36_s24, [#allocation6], %s280_s19, %s280_s19, %s281_s20  }
  0x23   :  { %273 = dma.done.wait [#allocation3], 256  }
  0x24   :  { %274 = vsyncadd [#allocation3], 4294967040 }
  0x25   :  { %275 = dma.done.wait [#allocation6], 256  }
  0x26   :  { %276 = vsyncadd [#allocation6], 4294967040  ;;  %v330_v0 = vld [vmem:[#allocation2] sm:$0xff]  ;;  %v332_v1 = vld [vmem:[#allocation2 + $0x8] sm:$0xff]  ;;  %v283_v6 = vmov 0.0   ;;  %s284_s1 = smov [#allocation7]  }
  0x27   :  { %v334_v2 = vld [vmem:[#allocation5] sm:$0xff]  ;;  %v336_v3 = vld [vmem:[#allocation5 + $0x8] sm:$0xff]  ;;  %v70_v4 = vand.u32 2147483647, %v330_v0  ;;  %v71_v5 = vand.u32 2147483647, %v332_v1 }
  0x28   :  { %vm112_vm0 = vcmp.gt.f32.partialorder %v334_v2, 0.5  ;;  %vm113_vm1 = vcmp.gt.f32.partialorder %v336_v3, 0.5  ;;  %vm116_vm2 = vcmp.lt.f32.partialorder %v334_v2, 0.5  ;;  %vm117_vm3 = vcmp.lt.f32.partialorder %v336_v3, 0.5  ;;  %s180_s6 = sshll.u32 %s284_s1, 4  ;;  %s181_s6 = int_to_ptr.vmem [resolvable:$true] %s180_s6 }
  0x29   :  { %v342_v7 = vsel %vm112_vm0, 1.0, %v283_v6  ;;  %v72_v8 = vsub.f32 0.0, %v70_v4  ;;  %v345_v9 = vsel %vm113_vm1, 1.0, %v283_v6  ;;  %v348_v10 = vsel %vm116_vm2, 1.0, %v283_v6  ;;  %s251_s7 = scalar_lea.vmem %s181_s6, 1024  ;;  %p256_p3 = scmp.lt.s32.totalorder %s181_s6, %s181_s6 }
  0x2a   :  { %v73_v11 = vsub.f32 0.0, %v71_v5  ;;  %v350_v12 = vsel %vm117_vm3, 1.0, %v283_v6  ;;  %v147_v13 = vadd.f32 %v345_v9, %v342_v7  ;;  %vm120_vm4 = vcmp.eq.f32.partialorder %v334_v2, 1.0  ;;  %p252_p2 = scmp.ne.s32.totalorder %s181_s6, %s251_s7  ;;  %p257_p4 = scmp.lt.s32.totalorder %s251_s7, %s251_s7 }
  0x2b   :  { %v74_v14 = vmul.f32 1.442695, %v72_v8  ;;  %v152_v15 = vadd.f32 %v350_v12, %v348_v10  ;;  %vm121_vm5 = vcmp.eq.f32.partialorder %v336_v3, 1.0  ;;  %v122_v16 = vsel %vm120_vm4, 1.0, %v283_v6 }
  0x2c   :  { %v76_v17 = vmul.f32 1.442695, %v73_v11  ;;  %v123_v18 = vsel %vm121_vm5, 1.0, %v283_v6  ;;  %vm124_vm6 = vcmp.eq.f32.partialorder %v334_v2, 0.0  ;;  %vm125_vm7 = vcmp.eq.f32.partialorder %v336_v3, 0.0  ;;  %149 = vst [vmem:[#allocation7 + $0x10] sm:$0xff] %v147_v13  ;;  %p258_p5 = por %p257_p4, %p256_p3 }
  0x2d   :  { %199 = vpow2.f32 %v74_v14  ;;  %v157_v19 = vadd.f32 %v123_v18, %v122_v16  ;;  %v126_v20 = vsel %vm124_vm6, 1.0, %v283_v6  ;;  %v127_v21 = vsel %vm125_vm7, 1.0, %v283_v6  ;;  %154 = vst [vmem:[#allocation7 + $0x18] sm:$0xff] %v152_v15 }
  0x2e   :  { %201 = vpow2.f32 %v76_v17  ;;  %vm110_vm8 = vcmp.gt.f32.partialorder %v330_v0, 0.0  ;;  %v162_v22 = vadd.f32 %v127_v21, %v126_v20  ;;  %vm111_vm9 = vcmp.gt.f32.partialorder %v332_v1, 0.0  ;;  %p259_p6 = pnand %p258_p5, %p252_p2 }
  0x2f   :  { %v132_v23 = vsel %vm110_vm8, %v122_v16, 0.0  ;;  %v133_v24 = vsel %vm111_vm9, %v123_v18, 0.0  ;;  %v134_v25 = vsel %vm110_vm8, 0.0, %v126_v20  ;;  %v135_v26 = vsel %vm111_vm9, 0.0, %v127_v21  ;;  %159 = vst [vmem:[#allocation7 + $0x20] sm:$0xff] %v157_v19 }
  0x30   :  { %v167_v27 = vadd.f32 %v133_v24, %v132_v23  ;;  %v172_v28 = vadd.f32 %v135_v26, %v134_v25  ;;  %164 = vst [vmem:[#allocation7 + $0x28] sm:$0xff] %v162_v22  ;;  %v68_v41 = vmax.f32 %v330_v0, 0.0  ;;  %v69_v44 = vmax.f32 %v332_v1, 0.0 }
  0x32   :  { %169 = vst [vmem:[#allocation7 + $0x30] sm:$0xff] %v167_v27  ;;  %174 = vst [vmem:[#allocation7 + $0x38] sm:$0xff] %v172_v28 }
  0x37   :  { %v200_v29 = vpop.eup %199 }
  0x38   :  { %v202_v30 = vpop.eup %201  ;;  %v78_v31 = vadd.f32 1.0, %v200_v29  ;;  %v81_v33 = vmul.f32 -0.5, %v200_v29  ;;  %v84_v36 = vand.u32 2147483647, %v200_v29 }
  0x39   :  { %v87_v32 = vadd.f32 1.0, %v202_v30  ;;  %v90_v34 = vmul.f32 -0.5, %v202_v30  ;;  %v93_v38 = vand.u32 2147483647, %v202_v30 }
  0x3a   :  { %203 = vlog2.f32 %v78_v31  ;;  %v82_v35 = vadd.f32 1.0, %v81_v33  ;;  %vm85_vm10 = vcmp.lt.f32.partialorder %v84_v36, 0.0004427343 }
  0x3b   :  { %205 = vlog2.f32 %v87_v32  ;;  %v91_v37 = vadd.f32 1.0, %v90_v34  ;;  %vm94_vm11 = vcmp.lt.f32.partialorder %v93_v38, 0.0004427343 }
  0x3c   :  { %v83_v39 = vmul.f32 %v200_v29, %v82_v35 }
  0x3d   :  { %v92_v42 = vmul.f32 %v202_v30, %v91_v37 }
  0x44   :  { %v204_v40 = vpop.eup %203 }
  0x45   :  { %v206_v43 = vpop.eup %205  ;;  %v80_v45 = vmul.f32 0.6931472, %v204_v40 }
  0x46   :  { %v89_v46 = vmul.f32 0.6931472, %v206_v43 }
  0x47   :  { %v86_v47 = vsel %vm85_vm10, %v83_v39, %v80_v45 }
  0x48   :  { %v95_v48 = vsel %vm94_vm11, %v92_v42, %v89_v46  ;;  %v96_v49 = vadd.f32 %v86_v47, %v68_v41 }
  0x49   :  { %v97_v50 = vadd.f32 %v95_v48, %v69_v44 }
  0x4a   :  { %v98_v51 = vsub.f32 %v96_v49, %v330_v0  ;;  %v102_v52 = vmin.f32 %v96_v49, 100.0 }
  0x4b   :  { %v99_v53 = vsub.f32 %v97_v50, %v332_v1  ;;  %v103_v54 = vmin.f32 %v97_v50, 100.0 }
  0x4c   :  { %v100_v55 = vmin.f32 %v98_v51, 100.0 }
  0x4d   :  { %v101_v56 = vmin.f32 %v99_v53, 100.0 }
  0x4e   :  { %v104_v57 = vsub.f32 %v100_v55, %v102_v52 }
  0x4f   :  { %v105_v58 = vsub.f32 %v101_v56, %v103_v54 }
  0x50   :  { %v106_v59 = vmul.f32 %v104_v57, %v334_v2 }
  0x51   :  { %v107_v60 = vmul.f32 %v105_v58, %v336_v3 }
  0x52   :  { %v108_v61 = vadd.f32 %v106_v59, %v102_v52 }
  0x53   :  { %v109_v62 = vadd.f32 %v107_v60, %v103_v54 }
  0x54   :  { %v128_v63 = vmul.f32 %v342_v7, %v108_v61  ;;  %v130_v4 = vmul.f32 %v348_v10, %v108_v61 }
  0x55   :  { %v129_v0 = vmul.f32 %v345_v9, %v109_v62  ;;  %v131_v5 = vmul.f32 %v350_v12, %v109_v62 }
  0x57   :  { %v137_v1 = vadd.f32 %v129_v0, %v128_v63  ;;  %v142_v6 = vadd.f32 %v131_v5, %v130_v4 }
  0x59   :  { %139 = vst [vmem:[#allocation7] sm:$0xff] %v137_v1  ;;  %144 = vst [vmem:[#allocation7 + $0x8] sm:$0xff] %v142_v6 }
  0x5a   :  { %262 = shalt.err (!%p259_p6)
}
  0x5b   :  { %s263_s10 = scalar_lea.hbm %s389_s2, 1024 }
  0x5c   :  { %p264_p7 = scmp.ne.s32.totalorder %s389_s2, %s263_s10  ;;  %p267_p8 = scmp.lt.u32.totalorder %s263_s10, %s389_s2 }
  0x5e   :  { %p269_p9 = pnand %p267_p8, %p264_p7 }
  0x60   :  { %272 = shalt.err (!%p269_p9)
}
  0x61   :  { %186 = dma.vmem_to_hbm [thread:$0]  %s181_s6, 1024, %s389_s2, [#allocation4], %s280_s19, %s280_s19, %s281_s20  }
  0x62   :  { %277 = dma.done.wait [#allocation4], 1024  }
  0x63   :  { %278 = vsyncadd [#allocation4], 4294966272 }
  0x64   :  { %190 = vsyncpa [#allocation3], 1 }
  0x65   :  { %191 = vsyncpa [#allocation6], 1 }
  0x66   :  { %192 = vsyncpa [#allocation4], 1 }

</bundles_post_ra>
